<compile_context>
chip_gen: v7x
topology: tpu7x:2x2x1
jax: 0.10.0
libtpu: 0.0.40
codegen_flags: <defaults>
</compile_context>

<pallas_src>
import functools

import jax
import jax.numpy as jnp
from jax import lax
from jax.experimental import pallas as pl
from jax.experimental.pallas import tpu as pltpu

_NEG_INF = -1e30


def _round_up(x, m):
    return (x + m - 1) // m * m


def _awc_kernel(x_ref, wvu_ref, bvu_ref, ww_ref, bw_ref, wc_ref, bc_ref,
                out_ref, m_sc, l_sc, acc_sc, *, n_valid, tile_n):
    i = pl.program_id(0)

    @pl.when(i == 0)
    def _init():
        m_sc[...] = jnp.full_like(m_sc, _NEG_INF)
        l_sc[...] = jnp.zeros_like(l_sc)
        acc_sc[...] = jnp.zeros_like(acc_sc)

    x = x_ref[...]                                   # (tile_n, L) bf16
    d = ww_ref.shape[0]

    # Fused gated-attention projection: one MXU pass through (L, 2D), f32 accum.
    z = jnp.dot(x, wvu_ref[...], preferred_element_type=jnp.float32) + bvu_ref[...]
    a_v = jnp.tanh(z[:, :d])                         # tanh branch    (tile_n, D)
    a_u = jax.nn.sigmoid(z[:, d:])                   # sigmoid branch (tile_n, D)
    gate = (a_v * a_u).astype(ww_ref.dtype)          # (tile_n, D) bf16

    logits = (jnp.dot(gate, ww_ref[...], preferred_element_type=jnp.float32)
              + bw_ref[...])                         # (tile_n, K) f32

    # Mask rows past the true bag size (x rows are zero-padded in the wrapper).
    # Cheap VPU work; hidden under the MXU passes.
    row = i * tile_n + lax.broadcasted_iota(jnp.int32, logits.shape, 0)
    logits = jnp.where(row < n_valid, logits, _NEG_INF)

    # Streaming (online) softmax over the instance axis.
    m_prev = m_sc[...]                                               # (1, K)
    m_new = jnp.maximum(m_prev, jnp.max(logits, axis=0, keepdims=True))
    alpha = jnp.exp(m_prev - m_new)                                  # (1, K)
    p = jnp.exp(logits - m_new)                                      # (tile_n, K)
    l_sc[...] = alpha * l_sc[...] + jnp.sum(p, axis=0, keepdims=True)

    # afeat accumulator: (K, L) = rescale * old + p^T @ x_tile (contract tile rows),
    # using the x tile already resident in VMEM -> x is read from HBM exactly once.
    contrib = lax.dot_general(p.astype(x.dtype), x, (((0,), (0,)), ((), ())),
                              preferred_element_type=jnp.float32)    # (K, L)
    acc_sc[...] = alpha.T * acc_sc[...] + contrib
    m_sc[...] = m_new

    @pl.when(i == pl.num_programs(0) - 1)
    def _finalize():
        inv_l = pl.reciprocal(l_sc[...].T, approx=True)              # (K, 1)
        afeat = acc_sc[...] * inv_l                                  # (K, L) f32
        pred = (jnp.dot(afeat.astype(wc_ref.dtype), wc_ref[...],
                        preferred_element_type=jnp.float32) + bc_ref[...])
        out_ref[...] = pred.astype(out_ref.dtype)


def attention_with_classifier(x, params, *, tile_n=1024):
    """x: (N, L) float32 bag of instance features. Returns (K, num_cls) float32."""
    wv, bv, wu, bu, ww, bw, wc, bc = params
    n, l = x.shape
    d = wv.shape[1]
    k = ww.shape[1]
    num_cls = wc.shape[1]

    compute_dtype = jnp.bfloat16

    # Fuse V/U projections into one (L, 2D) weight; feed the MXU bf16 operands.
    wvu = jnp.concatenate([wv, wu], axis=1).astype(compute_dtype)
    bvu = jnp.concatenate([bv, bu], axis=1).astype(jnp.float32)
    ww_c = ww.astype(compute_dtype)
    wc_c = wc.astype(compute_dtype)
    bw_c = bw.astype(jnp.float32)
    bc_c = bc.astype(jnp.float32)

    # Tile the instance axis; multiples of 16 keep bf16 sublane packing clean.
    tile_n = _round_up(min(tile_n, _round_up(n, 16)), 16)
    n_pad = _round_up(n, tile_n)
    x_c = x.astype(compute_dtype)
    if n_pad != n:
        x_c = jnp.pad(x_c, ((0, n_pad - n), (0, 0)))

    grid = (n_pad // tile_n,)
    kernel = functools.partial(_awc_kernel, n_valid=n, tile_n=tile_n)

    const = lambda i: (0, 0)  # weights/biases stay VMEM-resident (one-time DMA)
    grid_spec = pltpu.PrefetchScalarGridSpec(
        num_scalar_prefetch=0,
        grid=grid,
        in_specs=[
            pl.BlockSpec((tile_n, l), lambda i: (i, 0)),   # x tile (streamed)
            pl.BlockSpec((l, 2 * d), const),               # Wv || Wu
            pl.BlockSpec((1, 2 * d), const),               # bv || bu
            pl.BlockSpec((d, k), const),                   # Ww
            pl.BlockSpec((1, k), const),                   # bw
            pl.BlockSpec((l, num_cls), const),             # Wc
            pl.BlockSpec((1, num_cls), const),             # bc
        ],
        out_specs=pl.BlockSpec((k, num_cls), const),
        scratch_shapes=[
            pltpu.VMEM((1, k), jnp.float32),   # running max
            pltpu.VMEM((1, k), jnp.float32),   # running sum
            pltpu.VMEM((k, l), jnp.float32),   # running afeat accumulator
        ],
    )

    return pl.pallas_call(
        kernel,
        out_shape=jax.ShapeDtypeStruct((k, num_cls), jnp.float32),
        grid_spec=grid_spec,
        compiler_params=pltpu.CompilerParams(
            dimension_semantics=("arbitrary",)),
    )(x_c, wvu, bvu, ww_c, bw_c, wc_c, bc_c)


def init_params(key, L, D, K, num_cls):
    """nn.Linear-style init (uniform +-1/sqrt(fan_in)); weights stored (in, out)."""
    ks = jax.random.split(key, 8)

    def lin(kw, kb, fan_in, fan_out):
        bound = 1.0 / jnp.sqrt(fan_in)
        w = jax.random.uniform(kw, (fan_in, fan_out), jnp.float32, -bound, bound)
        b = jax.random.uniform(kb, (1, fan_out), jnp.float32, -bound, bound)
        return w, b

    wv, bv = lin(ks[0], ks[1], L, D)        # attention_V
    wu, bu = lin(ks[2], ks[3], L, D)        # attention_U
    ww, bw = lin(ks[4], ks[5], D, K)        # attention_weights
    wc, bc = lin(ks[6], ks[7], L, num_cls)  # classifier fc
    return (wv, bv, wu, bu, ww, bw, wc, bc)


def reference(x, params):
    """Pure-JAX f32 reference of the PyTorch forward pass."""
    wv, bv, wu, bu, ww, bw, wc, bc = params
    a_v = jnp.tanh(x @ wv + bv)
    a_u = jax.nn.sigmoid(x @ wu + bu)
    a = (a_v * a_u) @ ww + bw            # (N, K)
    a = jax.nn.softmax(a.T, axis=1)      # (K, N)
    afeat = a @ x                        # (K, L)
    return afeat @ wc + bc               # (K, num_cls)


if __name__ == "__main__":
    # Small shapes; N=20 with tile_n=16 exercises multi-tile streaming + row masking.
    N, L, D, K, NUM_CLS = 20, 32, 16, 1, 2

    key = jax.random.PRNGKey(0)
    kx, kp = jax.random.split(key)
    x = jax.random.normal(kx, (N, L), dtype=jnp.float32)
    params = init_params(kp, L, D, K, NUM_CLS)

    pred = attention_with_classifier(x, params, tile_n=16)
    pred = jax.block_until_ready(pred)

    ref = reference(x, params)
    assert pred.shape == (K, NUM_CLS)
    # Kernel uses bf16 MXU operands + approx reciprocal -> bf16-level tolerance vs f32 ref.
    assert jnp.allclose(pred, ref, atol=3e-2, rtol=3e-2), (pred, ref)

    print("KERNEL_OK")
</pallas_src>

<mosaic_0001>
module attributes {stable_mosaic.version = 11 : i64} {
  func.func @_awc_kernel(%arg0: i32, %arg1: memref<16x32xbf16, #tpu.memory_space<vmem>>, %arg2: memref<32x32xbf16, #tpu.memory_space<vmem>>, %arg3: memref<1x32xf32, #tpu.memory_space<vmem>>, %arg4: memref<16x1xbf16, #tpu.memory_space<vmem>>, %arg5: memref<1x1xf32, #tpu.memory_space<vmem>>, %arg6: memref<32x2xbf16, #tpu.memory_space<vmem>>, %arg7: memref<1x2xf32, #tpu.memory_space<vmem>>, %arg8: memref<1x2xf32, #tpu.memory_space<vmem>>, %arg9: memref<1x1xf32, #tpu.memory_space<vmem>>, %arg10: memref<1x1xf32, #tpu.memory_space<vmem>>, %arg11: memref<1x32xf32, #tpu.memory_space<vmem>>) attributes {dimension_semantics = [#tpu.dimension_semantics<arbitrary>], iteration_bounds = array<i64: 2>, scalar_prefetch = 0 : i64, scratch_operands = 3 : i64, tpu.core_type = #tpu.core_type<tc>, window_params = [{transform_indices = @transform_0, window_bounds = array<i64: 16, 32>}, {pipeline_mode = #tpu.pipeline_mode<synchronous>, transform_indices = @transform_1, window_bounds = array<i64: 32, 32>}, {pipeline_mode = #tpu.pipeline_mode<synchronous>, transform_indices = @transform_2, window_bounds = array<i64: 1, 32>}, {pipeline_mode = #tpu.pipeline_mode<synchronous>, transform_indices = @transform_3, window_bounds = array<i64: 16, 1>}, {pipeline_mode = #tpu.pipeline_mode<synchronous>, transform_indices = @transform_4, window_bounds = array<i64: 1, 1>}, {pipeline_mode = #tpu.pipeline_mode<synchronous>, transform_indices = @transform_5, window_bounds = array<i64: 32, 2>}, {pipeline_mode = #tpu.pipeline_mode<synchronous>, transform_indices = @transform_6, window_bounds = array<i64: 1, 2>}, {pipeline_mode = #tpu.pipeline_mode<synchronous>, transform_indices = @transform_7, window_bounds = array<i64: 1, 2>}]} {
    %c0_i32 = arith.constant 0 : i32
    %0 = arith.cmpi eq, %arg0, %c0_i32 : i32
    %1 = arith.extui %0 : i1 to i32
    %c0_i32_0 = arith.constant 0 : i32
    %2 = arith.cmpi ne, %1, %c0_i32_0 : i32
    scf.if %2 {
      %cst_29 = arith.constant -1.000000e+30 : f32
      %59 = vector.broadcast %cst_29 : f32 to vector<1x1xf32>
      %c0_30 = arith.constant 0 : index
      %c0_31 = arith.constant 0 : index
      %60 = vector.load %arg9[%c0_30, %c0_31] : memref<1x1xf32, #tpu.memory_space<vmem>>, vector<1x1xf32>
      tpu.vector_store %arg9[%c0_30, %c0_31], %59 {strides = array<i32>} : memref<1x1xf32, #tpu.memory_space<vmem>>, vector<1x1xf32>,
      %cst_32 = arith.constant 0.000000e+00 : f32
      %61 = vector.broadcast %cst_32 : f32 to vector<1x1xf32>
      %c0_33 = arith.constant 0 : index
      %c0_34 = arith.constant 0 : index
      %62 = vector.load %arg10[%c0_33, %c0_34] : memref<1x1xf32, #tpu.memory_space<vmem>>, vector<1x1xf32>
      tpu.vector_store %arg10[%c0_33, %c0_34], %61 {strides = array<i32>} : memref<1x1xf32, #tpu.memory_space<vmem>>, vector<1x1xf32>,
      %cst_35 = arith.constant 0.000000e+00 : f32
      %63 = vector.broadcast %cst_35 : f32 to vector<1x32xf32>
      %c0_36 = arith.constant 0 : index
      %c0_37 = arith.constant 0 : index
      %64 = vector.load %arg11[%c0_36, %c0_37] : memref<1x32xf32, #tpu.memory_space<vmem>>, vector<1x32xf32>
      tpu.vector_store %arg11[%c0_36, %c0_37], %63 {strides = array<i32>} : memref<1x32xf32, #tpu.memory_space<vmem>>, vector<1x32xf32>,
    } else {
    }
    %c0 = arith.constant 0 : index
    %c0_1 = arith.constant 0 : index
    %3 = vector.load %arg1[%c0, %c0_1] : memref<16x32xbf16, #tpu.memory_space<vmem>>, vector<16x32xbf16>
    %c0_2 = arith.constant 0 : index
    %c0_3 = arith.constant 0 : index
    %4 = vector.load %arg2[%c0_2, %c0_3] : memref<32x32xbf16, #tpu.memory_space<vmem>>, vector<32x32xbf16>
    %cst = arith.constant dense<0.000000e+00> : vector<16x32xf32>
    %5 = tpu.matmul %3, %4, %cst {dimension_numbers = #tpu.dot_dimension_numbers<[1], [0], [0], [1], [0, 0, 1, 1], [], []>} : vector<16x32xbf16>, vector<32x32xbf16>, vector<16x32xf32> -> vector<16x32xf32>
    %c0_4 = arith.constant 0 : index
    %c0_5 = arith.constant 0 : index
    %6 = vector.load %arg3[%c0_4, %c0_5] : memref<1x32xf32, #tpu.memory_space<vmem>>, vector<1x32xf32>
    %7 = vector.broadcast %6 : vector<1x32xf32> to vector<16x32xf32>
    %8 = arith.addf %5, %7 : vector<16x32xf32>
    %9 = vector.extract_strided_slice %8 {offsets = [0, 0], sizes = [16, 16], strides = [1, 1]} : vector<16x32xf32> to vector<16x16xf32>
    %10 = math.tanh %9 : vector<16x16xf32>
    %11 = vector.extract_strided_slice %8 {offsets = [0, 16], sizes = [16, 16], strides = [1, 1]} : vector<16x32xf32> to vector<16x16xf32>
    %12 = arith.negf %11 : vector<16x16xf32>
    %13 = math.exp %12 : vector<16x16xf32>
    %cst_6 = arith.constant 1.000000e+00 : f32
    %14 = vector.broadcast %cst_6 : f32 to vector<16x16xf32>
    %15 = arith.addf %14, %13 : vector<16x16xf32>
    %16 = arith.divf %14, %15 : vector<16x16xf32>
    %17 = arith.mulf %10, %16 : vector<16x16xf32>
    %18 = arith.truncf %17 : vector<16x16xf32> to vector<16x16xbf16>
    %c0_7 = arith.constant 0 : index
    %c0_8 = arith.constant 0 : index
    %19 = vector.load %arg4[%c0_7, %c0_8] : memref<16x1xbf16, #tpu.memory_space<vmem>>, vector<16x1xbf16>
    %cst_9 = arith.constant dense<0.000000e+00> : vector<16x1xf32>
    %20 = tpu.matmul %18, %19, %cst_9 {dimension_numbers = #tpu.dot_dimension_numbers<[1], [0], [0], [1], [0, 0, 1, 1], [], []>} : vector<16x16xbf16>, vector<16x1xbf16>, vector<16x1xf32> -> vector<16x1xf32>
    %c0_10 = arith.constant 0 : index
    %c0_11 = arith.constant 0 : index
    %21 = vector.load %arg5[%c0_10, %c0_11] : memref<1x1xf32, #tpu.memory_space<vmem>>, vector<1x1xf32>
    %22 = vector.broadcast %21 : vector<1x1xf32> to vector<16x1xf32>
    %23 = arith.addf %20, %22 : vector<16x1xf32>
    %c16_i32 = arith.constant 16 : i32
    %24 = arith.muli %arg0, %c16_i32 : i32
    %25 = tpu.iota {dimensions = array<i32: 0>} : vector<16x1xi32>
    %26 = vector.broadcast %24 : i32 to vector<16x1xi32>
    %27 = arith.addi %26, %25 : vector<16x1xi32>
    %c20_i32 = arith.constant 20 : i32
    %28 = vector.broadcast %c20_i32 : i32 to vector<16x1xi32>
    %29 = arith.cmpi slt, %27, %28 : vector<16x1xi32>
    %cst_12 = arith.constant -1.000000e+30 : f32
    %30 = vector.broadcast %cst_12 : f32 to vector<16x1xf32>
    %31 = arith.select %29, %23, %30 : vector<16x1xi1>, vector<16x1xf32>
    %c0_13 = arith.constant 0 : index
    %c0_14 = arith.constant 0 : index
    %32 = vector.load %arg9[%c0_13, %c0_14] : memref<1x1xf32, #tpu.memory_space<vmem>>, vector<1x1xf32>
    %cst_15 = arith.constant dense<0xFF800000> : vector<1xf32>
    %33 = vector.multi_reduction <maximumf>, %31, %cst_15 [0] : vector<16x1xf32> to vector<1xf32>
    %34 = vector.shape_cast %33 : vector<1xf32> to vector<1x1xf32>
    %35 = arith.maximumf %32, %34 : vector<1x1xf32>
    %36 = arith.subf %32, %35 : vector<1x1xf32>
    %37 = math.exp %36 : vector<1x1xf32>
    %38 = vector.broadcast %35 : vector<1x1xf32> to vector<16x1xf32>
    %39 = arith.subf %31, %38 : vector<16x1xf32>
    %40 = math.exp %39 : vector<16x1xf32>
    %c0_16 = arith.constant 0 : index
    %c0_17 = arith.constant 0 : index
    %41 = vector.load %arg10[%c0_16, %c0_17] : memref<1x1xf32, #tpu.memory_space<vmem>>, vector<1x1xf32>
    %42 = arith.mulf %37, %41 : vector<1x1xf32>
    %cst_18 = arith.constant dense<0.000000e+00> : vector<1xf32>
    %43 = vector.multi_reduction <add>, %40, %cst_18 [0] : vector<16x1xf32> to vector<1xf32>
    %44 = vector.shape_cast %43 : vector<1xf32> to vector<1x1xf32>
    %45 = arith.addf %42, %44 : vector<1x1xf32>
    %c0_19 = arith.constant 0 : index
    %c0_20 = arith.constant 0 : index
    %46 = vector.load %arg10[%c0_19, %c0_20] : memref<1x1xf32, #tpu.memory_space<vmem>>, vector<1x1xf32>
    tpu.vector_store %arg10[%c0_19, %c0_20], %45 {strides = array<i32>} : memref<1x1xf32, #tpu.memory_space<vmem>>, vector<1x1xf32>,
    %47 = arith.truncf %40 : vector<16x1xf32> to vector<16x1xbf16>
    %cst_21 = arith.constant dense<0.000000e+00> : vector<1x32xf32>
    %48 = tpu.matmul %47, %3, %cst_21 {dimension_numbers = #tpu.dot_dimension_numbers<[0], [0], [1], [1], [0, 1, 1, 1], [], []>} : vector<16x1xbf16>, vector<16x32xbf16>, vector<1x32xf32> -> vector<1x32xf32>
    %49 = tpu.transpose %37, [1, 0] : vector<1x1xf32> -> vector<1x1xf32>
    %c0_22 = arith.constant 0 : index
    %c0_23 = arith.constant 0 : index
    %50 = vector.load %arg11[%c0_22, %c0_23] : memref<1x32xf32, #tpu.memory_space<vmem>>, vector<1x32xf32>
    %51 = vector.broadcast %49 : vector<1x1xf32> to vector<1x32xf32>
    %52 = arith.mulf %51, %50 : vector<1x32xf32>
    %53 = arith.addf %52, %48 : vector<1x32xf32>
    %c0_24 = arith.constant 0 : index
    %c0_25 = arith.constant 0 : index
    %54 = vector.load %arg11[%c0_24, %c0_25] : memref<1x32xf32, #tpu.memory_space<vmem>>, vector<1x32xf32>
    tpu.vector_store %arg11[%c0_24, %c0_25], %53 {strides = array<i32>} : memref<1x32xf32, #tpu.memory_space<vmem>>, vector<1x32xf32>,
    %c0_26 = arith.constant 0 : index
    %c0_27 = arith.constant 0 : index
    %55 = vector.load %arg9[%c0_26, %c0_27] : memref<1x1xf32, #tpu.memory_space<vmem>>, vector<1x1xf32>
    tpu.vector_store %arg9[%c0_26, %c0_27], %35 {strides = array<i32>} : memref<1x1xf32, #tpu.memory_space<vmem>>, vector<1x1xf32>,
    %c1_i32 = arith.constant 1 : i32
    %56 = arith.cmpi eq, %arg0, %c1_i32 : i32
    %57 = arith.extui %56 : i1 to i32
    %c0_i32_28 = arith.constant 0 : i32
    %58 = arith.cmpi ne, %57, %c0_i32_28 : i32
    scf.if %58 {
      %c0_29 = arith.constant 0 : index
      %c0_30 = arith.constant 0 : index
      %59 = vector.load %arg10[%c0_29, %c0_30] : memref<1x1xf32, #tpu.memory_space<vmem>>, vector<1x1xf32>
      %60 = tpu.transpose %59, [1, 0] : vector<1x1xf32> -> vector<1x1xf32>
      %61 = tpu.reciprocal %60 {approx = true} : vector<1x1xf32> -> vector<1x1xf32>
      %c0_31 = arith.constant 0 : index
      %c0_32 = arith.constant 0 : index
      %62 = vector.load %arg11[%c0_31, %c0_32] : memref<1x32xf32, #tpu.memory_space<vmem>>, vector<1x32xf32>
      %63 = vector.broadcast %61 : vector<1x1xf32> to vector<1x32xf32>
      %64 = arith.mulf %62, %63 : vector<1x32xf32>
      %65 = arith.truncf %64 : vector<1x32xf32> to vector<1x32xbf16>
      %c0_33 = arith.constant 0 : index
      %c0_34 = arith.constant 0 : index
      %66 = vector.load %arg6[%c0_33, %c0_34] : memref<32x2xbf16, #tpu.memory_space<vmem>>, vector<32x2xbf16>
      %cst_35 = arith.constant dense<0.000000e+00> : vector<1x2xf32>
      %67 = tpu.matmul %65, %66, %cst_35 {dimension_numbers = #tpu.dot_dimension_numbers<[1], [0], [0], [1], [0, 0, 1, 1], [], []>} : vector<1x32xbf16>, vector<32x2xbf16>, vector<1x2xf32> -> vector<1x2xf32>
      %c0_36 = arith.constant 0 : index
      %c0_37 = arith.constant 0 : index
      %68 = vector.load %arg7[%c0_36, %c0_37] : memref<1x2xf32, #tpu.memory_space<vmem>>, vector<1x2xf32>
      %69 = arith.addf %67, %68 : vector<1x2xf32>
      %c0_38 = arith.constant 0 : index
      %c0_39 = arith.constant 0 : index
      %70 = vector.load %arg8[%c0_38, %c0_39] : memref<1x2xf32, #tpu.memory_space<vmem>>, vector<1x2xf32>
      tpu.vector_store %arg8[%c0_38, %c0_39], %69 {strides = array<i32>} : memref<1x2xf32, #tpu.memory_space<vmem>>, vector<1x2xf32>,
    } else {
    }
    return
  }
  func.func @transform_0(%arg0: i32) -> (i32, i32) {
    %c0_i32 = arith.constant 0 : i32
    %c0_i32_0 = arith.constant 0 : i32
    return %arg0, %c0_i32 : i32, i32
  }
  func.func @transform_1(%arg0: i32) -> (i32, i32) {
    %c0_i32 = arith.constant 0 : i32
    %c0_i32_0 = arith.constant 0 : i32
    %c0_i32_1 = arith.constant 0 : i32
    return %c0_i32, %c0_i32_0 : i32, i32
  }
  func.func @transform_2(%arg0: i32) -> (i32, i32) {
    %c0_i32 = arith.constant 0 : i32
    %c0_i32_0 = arith.constant 0 : i32
    %c0_i32_1 = arith.constant 0 : i32
    return %c0_i32, %c0_i32_0 : i32, i32
  }
  func.func @transform_3(%arg0: i32) -> (i32, i32) {
    %c0_i32 = arith.constant 0 : i32
    %c0_i32_0 = arith.constant 0 : i32
    %c0_i32_1 = arith.constant 0 : i32
    return %c0_i32, %c0_i32_0 : i32, i32
  }
  func.func @transform_4(%arg0: i32) -> (i32, i32) {
    %c0_i32 = arith.constant 0 : i32
    %c0_i32_0 = arith.constant 0 : i32
    %c0_i32_1 = arith.constant 0 : i32
    return %c0_i32, %c0_i32_0 : i32, i32
  }
  func.func @transform_5(%arg0: i32) -> (i32, i32) {
    %c0_i32 = arith.constant 0 : i32
    %c0_i32_0 = arith.constant 0 : i32
    %c0_i32_1 = arith.constant 0 : i32
    return %c0_i32, %c0_i32_0 : i32, i32
  }
  func.func @transform_6(%arg0: i32) -> (i32, i32) {
    %c0_i32 = arith.constant 0 : i32
    %c0_i32_0 = arith.constant 0 : i32
    %c0_i32_1 = arith.constant 0 : i32
    return %c0_i32, %c0_i32_0 : i32, i32
  }
  func.func @transform_7(%arg0: i32) -> (i32, i32) {
    %c0_i32 = arith.constant 0 : i32
    %c0_i32_0 = arith.constant 0 : i32
    %c0_i32_1 = arith.constant 0 : i32
    return %c0_i32, %c0_i32_0 : i32, i32
  }
}

</mosaic_0001>

<bundles_post_ra>
// kernel: tpu_custom_call.1
= control target key start
LH: loop header
LB: loop body
LE: loop exit
PB: predicated region body
PF: predicated region fallthrough
CT: control target
= control target key end

     0   :  { %s1034_s0 = inlined_call_operand.vmem [shape: bf16[32,32], index: 0, kind: input, shape index: {}]   ;;  %s1035_s1 = inlined_call_operand.vmem [shape: bf16[32,32], index: 1, kind: input, shape index: {}]   ;;  %s1036_s2 = inlined_call_operand.vmem [shape: f32[1,32], index: 2, kind: input, shape index: {}]   ;;  %s1037_s3 = inlined_call_operand.vmem [shape: bf16[16,1], index: 3, kind: input, shape index: {}]   ;;  %s1038_s4 = inlined_call_operand.<no memory space> [shape: f32[1,1], index: 4, kind: input, shape index: {}]   ;;  %s1039_s5 = inlined_call_operand.vmem [shape: bf16[32,2], index: 5, kind: input, shape index: {}]   ;;  %s1040_s6 = inlined_call_operand.vmem [shape: f32[1,2], index: 6, kind: input, shape index: {}]   ;;  %s1041_s7 = inlined_call_operand.hbm [shape: f32[1,2], index: 7, kind: output, shape index: {}]  }
   0x1   :  { %v12_v0 = vstv %s1038_s4 }
   0x2   :  { %13 = vst [vmem:[#allocation5] sm:$0x1] %v12_v0 }
   0x3   :  { %14 = vsyncpa [#allocation7], 0  ;;  %s957_s26 = smov 0  }
   0x4 LB: > { %s963_s27 = sadd.s32 4294967295, %s902_s26   ;;  %p752_p0 = scmp.ge.s32.totalorder %s902_s26, 1  ;;  %s902_s26 = sphi %s957_s26, %s20_s26  }
   0x5   : > { %p236_p1 = scmp.lt.s32.totalorder %s902_s26, 3 }
   0x7   : > { %p237_p2 = pnand %p752_p0, %p236_p1 }
   0x8   : > { %s753_s4 = sshll.u32 (!%p237_p2), %s963_s27, 1  ;;  %p755_p4 = scmp.ne.s32.totalorder (!%p237_p2), %s963_s27, 0 }
   0x9   : > { %240 = sbr.rel (%p237_p2) target bundleno = 1330 (0x532), region = 48  ;;  %p264_p3 = scmp.lt.s32.totalorder (!%p237_p2), %s753_s4, 3 }
  0x10   : > { %s1043_s4 = smov (!%p264_p3, %s753_s4), 3  ;;  %273 = sbr.rel (%p755_p4) target bundleno = 23 (0x17), region = 52 }
  0x11   : > { %s754_s28 = sshll.u32 %s1043_s4, 2  ;;  %vm274_vm0 = vcmask (!%p755_p4), 0   ;;  %vm277_vm1 = vcmask (!%p755_p4), 253952   ;;  %v904_v1 = vmov (!%p755_p4), -1e+30   ;;  %v905_v2 = vmov (!%p755_p4), 0.0  }
  0x12   : > { %s267_s8 = scalar_lea.vmem %s1034_s0, %s754_s28  ;;  %275 = vst.msk [vmem:[#allocation2] sm:$0x1] (!%p755_p4), %vm274_vm0, %v904_v1  ;;  %276 = vst.msk [vmem:[#allocation3] sm:$0x1] (!%p755_p4), %vm274_vm0, %v905_v2 }
  0x13   : > { %278 = vst.msk [vmem:[#allocation4] sm:$0x1] (!%p755_p4), %vm277_vm1, %v905_v2 }
  0x17 PF: > { %v839_v3 = vld [vmem:[%s1035_s1] sm:$0xff]   ;;  %v906_v4 = vmov 0.0   ;;  %v840_v5 = vld [vmem:[%s1035_s1 + $0x8] sm:$0xff]   ;;  %vm907_vm2 = vmmov 0   ;;  %vm309_vm3 = vcmask 261120   ;;  %s908_s17 = smov 112   ;;  %v440_v30 = vlaneseq }
  0x18   : > { %786 = vmatprep.subr.bf16.mxu0 %v906_v4  ;;  %794 = vmatprep.subr.bf16.mxu1 %v906_v4  ;;  %v841_v6 = vld [vmem:[%s267_s8] sm:$0xff]   ;;  %vm394_vm4 = vcmask 130048   ;;  %s766_s18 = sshll.u32 %s963_s27, 4  ;;  %vm451_vm7 = vcmask 7168   ;;  %v909_v56 = vmov 0   ;;  %vm489_vm8 = vcmask 0  }
  0x19   : > { %787 = vmatpush3.bf16.msra.mxu0 %v839_v3  ;;  %790 = vmatprep.mubr.msk.bf16.mxu0 %vm907_vm2, %v906_v4  ;;  %v756_v7 = vld [vmem:[%s1036_s2] ss:$0 sm:$0xff]  ;;  %v441_v31 = vshrl.u32 %v440_v30, 7  ;;  %v443_v32 = vstv %s766_s18  ;;  %v763_v35 = vld [vmem:[#allocation5] ss:$0 sm:$0xff]  ;;  %vm592_vm9 = vcmask 253952  }
  0x1a   : > { %788 = vmatprep.subr.bf16.mxu0 %v906_v4  ;;  %796 = vmatprep.mubr.msk.bf16.mxu1 %vm907_vm2, %v906_v4  ;;  %v842_v20 = vld [vmem:[%s1037_s3] sm:$0xff]   ;;  %p768_p5 = scmp.ne.s32.totalorder %s963_s27, 1 }
  0x1b   : > { %795 = vmatpush3.bf16.msra.mxu1 %v842_v20  ;;  %v442_v33 = vadd.s32 8, %v441_v31  ;;  %v444_v34 = vadd.s32 %v443_v32, %v441_v31  ;;  %v450_v53 = vld [vmem:[#allocation2] sm:$0x1]  ;;  %v468_v55 = vsub.s32 0, %v441_v31  ;;  %838 = vset.pattern.permute.xlu0 %v909_v56  ;;  %v911_v30 = vmov (!%p768_p5), 0  }
  0x1c   : > { %800 = vmatprep.subr.bf16.mxu1 %v906_v4  ;;  %vm912_vm10 = vmmov (!%p768_p5), 0   ;;  %vm701_vm11 = vcmask (!%p768_p5), 8192  }
  0x1d   : > { %789 = vmatpush3.bf16.msra.mxu0 %v840_v5  ;;  %v445_v36 = vadd.s32 %v443_v32, %v442_v33  ;;  %vm446_vm5 = vcmp.lt.s32.totalorder %v444_v34, 20  ;;  %v863_v33 = vld [vmem:[%s1039_s5 + $0x8] sm:$0xff] (!%p768_p5)  }
  0x1f   : > { %vm447_vm6 = vcmp.lt.s32.totalorder %v445_v36, 20 }
  0x20   : > { %791 = vmatmul.mubr.msk.bf16.vlgmr.msra.gmra.mrb[0].mxu0 %vm309_vm3, %v841_v6 }
  0xf3   : > { %v347_v8 = vpop.f32.mrb[0].mxu0 }
  0xf4   : > { %v348_v9 = vadd.f32 %v756_v7, %v347_v8  ;;  %v792_v10 = vpop.f32.mrb[1].mxu0 }
  0xf5   : > { %v350_v11 = vpop.f32.mrb[2].mxu0 }
  0xf6   : > { %v761_v12 = vmul.f32 -1.442695, %v348_v9  ;;  %v351_v13 = vadd.f32 %v756_v7, %v350_v11  ;;  %v793_v14 = vpop.f32.mrb[3].mxu0 }
  0xf8   : > { %843 = vpow2.f32 %v761_v12  ;;  %v762_v15 = vmul.f32 -1.442695, %v351_v13  ;;  %v477_v12 = vld [vmem:[#allocation3] sm:$0x1] }
  0xfa   : > { %845 = vpow2.f32 %v762_v15 }
 0x102   : > { %v844_v16 = vpop.eup %843 }
 0x103   : > { %v362_v17 = vadd.f32 1.0, %v844_v16 }
 0x104   : > { %v846_v18 = vpop.eup %845 }
 0x105   : > { %847 = vrcp.f32 %v362_v17  ;;  %v363_v19 = vadd.f32 1.0, %v846_v18 }
 0x107   : > { %849 = vrcp.f32 %v363_v19  ;;  %v584_v19 = vld [vmem:[#allocation4] sm:$0x1] }
 0x108   : > { %851 = vtanh.f32 %v348_v9 }
 0x109   : > { %853 = vtanh.f32 %v351_v13 }
 0x10f   : > { %v848_v21 = vpop.eup %847 }
 0x110   : > { %370 = vrot.lane.b32.xlu0 %v848_v21, %s908_s17 }
 0x111   : > { %v850_v22 = vpop.eup %849 }
 0x112   : > { %v852_v24 = vpop.eup %851 }
 0x113   : > { %v854_v25 = vpop.eup %853 }
 0x114   : > { %372 = vrot.lane.b32.xlu0 %v850_v22, %s908_s17 }
 0x182   : > { %v371_v23 = vpop.permute.xlu0 %370 }
 0x183   : > { %v376_v27 = vmul.f32 %v852_v24, %v371_v23 }
 0x186   : > { %v373_v26 = vpop.permute.xlu0 %372 }
 0x187   : > { %v377_v28 = vmul.f32 %v854_v25, %v373_v26 }
 0x189   : > { %v378_v29 = vpack.c.bf16 %v377_v28, %v376_v27  ;;  %v862_v28 = vld [vmem:[%s1039_s5] sm:$0xff] (!%p768_p5)  }
 0x18b   : > { %797 = vmatmul.mubr.msk.bf16.vlgmr.msra.gmra.mrb[0].mxu1 %vm394_vm4, %v378_v29  ;;  %v910_v29 = vmov (!%p768_p5), 0.0  }
 0x18c   : > { %801 = vmatpush3.bf16.msra.mxu1 %v841_v6  ;;  %802 = vmatprep.mubr.msk.bf16.mxu1 %vm907_vm2, %v906_v4 }
 0x18d   : > { %806 = vmatprep.subr.bf16.mxu0 (!%p768_p5), %v910_v29  ;;  %810 = vmatprep.mubr.msk.bf16.mxu0 (!%p768_p5), %vm912_vm10, %v910_v29 }
 0x18e   : > { %807 = vmatpush3.bf16.msra.mxu0 (!%p768_p5), %v862_v28 }
 0x18f   : > { %808 = vmatprep.subr.bf16.mxu0 (!%p768_p5), %v910_v29 }
 0x192   : > { %809 = vmatpush3.bf16.msra.mxu0 (!%p768_p5), %v863_v33 }
 0x25e   : > { %v432_v37 = vpop.f32.mrb[0].mxu1 }
 0x25f   : > { %v433_v38 = vadd.f32 %v763_v35, %v432_v37  ;;  %v798_v39 = vpop.f32.mrb[1].mxu1 }
 0x260   : > { %v435_v40 = vpop.f32.mrb[2].mxu1 }
 0x261   : > { %v448_v41 = vsel %vm446_vm5, %v433_v38, -1e+30  ;;  %v436_v42 = vadd.f32 %v763_v35, %v435_v40  ;;  %v799_v43 = vpop.f32.mrb[3].mxu1  ;;  %v645_v38 = vld [vmem:[%s1040_s6] sm:$0x1] (!%p768_p5) }
 0x262   : > { %v452_v45 = vsel %vm451_vm7, %v448_v41, -inf }
 0x263   : > { %v449_v44 = vsel %vm447_vm6, %v436_v42, -1e+30 }
 0x264   : > { %v453_v46 = vsel %vm451_vm7, %v449_v44, -inf }
 0x265   : > { %v454_v47 = vmax.f32 %v452_v45, %v453_v46 }
 0x267   : > { %v455_v48 = vrot.slane %v454_v47, 4 }
 0x269   : > { %v456_v49 = vmax.f32 %v454_v47, %v455_v48 }
 0x26b   : > { %v457_v50 = vrot.slane %v456_v49, 2 }
 0x26d   : > { %v458_v51 = vmax.f32 %v456_v49, %v457_v50 }
 0x26f   : > { %v459_v52 = vrot.slane %v458_v51, 1 }
 0x271   : > { %v460_v54 = vmax.f32 %v458_v51, %v459_v52 }
 0x273   : > { %v461_v57 = vmax.f32 %v450_v53, %v460_v54 }
 0x275   : > { %v469_v58 = vrot.slane %v461_v57, %v468_v55  ;;  %594 = vst.msk [vmem:[#allocation2] sm:$0x1] %vm489_vm8, %v461_v57  ;;  %v462_v63 = vsub.f32 %v450_v53, %v461_v57 }
 0x277   : > { %v471_v59 = vsub.f32 %v448_v41, %v469_v58  ;;  %v472_v60 = vsub.f32 %v449_v44, %v469_v58  ;;  %v463_v0 = vmul.f32 1.442695, %v462_v63 }
 0x279   : > { %v473_v61 = vmul.f32 1.442695, %v471_v59  ;;  %v475_v62 = vmul.f32 1.442695, %v472_v60 }
 0x27b   : > { %855 = vpow2.f32 %v473_v61 }
 0x27c   : > { %857 = vpow2.f32 %v475_v62 }
 0x27d   : > { %859 = vpow2.f32 %v463_v0 }
 0x285   : > { %v856_v1 = vpop.eup %855 }
 0x286   : > { %v858_v2 = vpop.eup %857  ;;  %v479_v3 = vsel %vm451_vm7, %v856_v1, 0.0 }
 0x287   : > { %v480_v4 = vsel %vm451_vm7, %v858_v2, 0.0  ;;  %v491_v5 = vpack.c.bf16 %v858_v2, %v856_v1  ;;  %v860_v11 = vpop.eup %859 }
 0x288   : > { %v481_v6 = vadd.f32 %v480_v4, %v479_v3  ;;  %v478_v15 = vmul.f32 %v860_v11, %v477_v12 }
 0x289   : > { %492 = vxpose.xlu1.c.b16.start.end [1/1] (short) (narrow) %v491_v5, 16 }
 0x28a   : > { %v482_v7 = vrot.slane %v481_v6, 4 }
 0x28c   : > { %v483_v8 = vadd.f32 %v482_v7, %v481_v6 }
 0x28e   : > { %v484_v9 = vrot.slane %v483_v8, 2 }
 0x290   : > { %v485_v10 = vadd.f32 %v484_v9, %v483_v8 }
 0x292   : > { %v486_v13 = vrot.slane %v485_v10, 1 }
 0x293   : > { %552 = vxpose.xlu1.b32.start.end [1/1] (short) (narrow) %v860_v11, 8 }
 0x294   : > { %v487_v14 = vadd.f32 %v486_v13, %v485_v10 }
 0x296   : > { %v488_v16 = vadd.f32 %v487_v14, %v478_v15 }
 0x298   : > { %490 = vst.msk [vmem:[#allocation3] sm:$0x1] %vm489_vm8, %v488_v16 }
 0x29f   : > { %v599_v27 = vld [vmem:[#allocation3] sm:$0x1] (!%p768_p5) }
 0x2ef   : > { %v500_v17 = vpop.trf.xlu1 }
 0x2f0   : > { %803 = vmatmul.mubr.msk.bf16.vlgmr.msra.gmra.mrb[4].mxu1 %vm394_vm4, %v500_v17 }
 0x313   : > { %v568_v18 = vpop.trf.xlu1 }
 0x314   : > { %587 = vperm.xlu0 %838, %v568_v18  }
 0x332   : > { %600 = vxpose.xlu0.b32.start.end [1/1] (short) (narrow) (!%p768_p5), %v599_v27, 8 }
 0x35b   : > { %861 = vset.pattern.permute.xlu0 (!%p768_p5), %v911_v30 }
 0x393   : > { %v588_v20 = vpop.permute.xlu0 %587 }
 0x394   : > { %v590_v21 = vmul.f32 %v588_v20, %v584_v19 }
 0x3b2   : > { %v616_v31 = vpop.trf.xlu0 (!%p768_p5) }
 0x3b3   : > { %864 = vrcp.f32 (!%p768_p5), %v616_v31 }
 0x3bd   : > { %v865_v32 = vpop.eup (!%p768_p5), %864 }
 0x3be   : > { %636 = vperm.xlu0 (!%p768_p5), %861, %v865_v32  }
 0x3c0   : > { %598 = sbr.rel (%p768_p5) target bundleno = 1305 (0x519), region = 56 }
 0x3c3   : > { %v546_v22 = vpop.f32.mrb[4].mxu1 }
 0x3c4   : > { %v591_v23 = vadd.f32 %v590_v21, %v546_v22  ;;  %v804_v24 = vpop.f32.mrb[5].mxu1 }
 0x3c5   : > { %v549_v25 = vpop.f32.mrb[6].mxu1 }
 0x3c6   : > { %593 = vst.msk [vmem:[#allocation4] sm:$0x1] %vm592_vm9, %v591_v23  ;;  %v805_v26 = vpop.f32.mrb[7].mxu1 }
 0x3cd   : > { %v633_v34 = vld [vmem:[#allocation4] sm:$0x1] }
 0x43d   : > { %v637_v35 = vpop.permute.xlu0 %636 }
 0x43e   : > { %v639_v36 = vmul.f32 %v637_v35, %v633_v34 }
 0x440   : > { %v640_v37 = vpack.c.bf16 %v639_v36, %v639_v36 }
 0x442   : > { %811 = vmatmul.mubr.msk.bf16.vlgmr.msra.gmra.mrb[0].mxu0 %vm309_vm3, %v640_v37 }
 0x515   : > { %v695_v39 = vpop.f32.mrb[0].mxu0 }
 0x516   : > { %v696_v40 = vadd.f32 %v695_v39, %v645_v38  ;;  %v812_v41 = vpop.f32.mrb[1].mxu0 }
 0x517   : > { %v698_v42 = vpop.f32.mrb[2].mxu0 }
 0x518   : > { %702 = vst.msk [vmem:[#allocation6] sm:$0x1] %vm701_vm11, %v696_v40  ;;  %v813_v43 = vpop.f32.mrb[3].mxu0 }
 0x519 PF: > { %p818_p6 = scmp.eq.s32.totalorder %s963_s27, 1  ;;  %s913_s25 = smov [#allocation6]  }
 0x51a   : > { %s710_s4 = sshll.u32 %s913_s25, 4  ;;  %s711_s4 = int_to_ptr.vmem [resolvable:$true] %s710_s4 }
 0x51b   : > { %s866_s28 = scalar_lea.vmem %s711_s4, 16  ;;  %s872_s29 = scalar_lea.vmem %s711_s4, 32 }
 0x51c   : > { %p867_p7 = scmp.ne.s32.totalorder %s711_s4, %s866_s28  ;;  %p873_p10 = scmp.lt.s32.totalorder %s711_s4, %s711_s4 }
 0x51d   : > { %p874_p11 = scmp.lt.s32.totalorder %s872_s29, %s866_s28 }
 0x51e   : > { %p868_p8 = pnand %p867_p7, %p818_p6 }
 0x51f   : > { %p875_p12 = por %p874_p11, %p873_p10 }
 0x520   : > { %p869_p9 = pneg %p868_p8 }
 0x522   : > { %p876_p13 = pnand %p875_p12, %p869_p9 }
 0x524   : > { %879 = shalt.err (!%p876_p13)
}
 0x525   : > { %s880_s9 = scalar_lea.hbm %s1041_s7, 16 }
 0x526   : > { %p881_p0 = scmp.ne.s32.totalorder %s1041_s7, %s880_s9  ;;  %p886_p3 = scmp.lt.u32.totalorder %s880_s9, %s1041_s7 }
 0x528   : > { %p882_p1 = pnand %p881_p0, %p818_p6 }
 0x52a   : > { %p883_p2 = pneg %p882_p1 }
 0x52c   : > { %p888_p4 = pnand %p886_p3, %p883_p2 }
 0x52e   : > { %891 = shalt.err (!%p888_p4)
}
 0x52f   : > { %815 = dma.vmem_to_hbm [thread:$0]  (%p818_p6), %s711_s4, 16, %s1041_s7, [#allocation7]  }
 0x530   : > { %897 = dma.done.wait (%p818_p6), [#allocation7], 16  }
 0x531   : > { %899 = vsyncadd (%p818_p6), [#allocation7], 4294967280 }
 0x532 PF: > { %s20_s26 = sadd.s32 1, %s902_s26  }
 0x533   : > { %p17_p5 = scmp.ge.s32.totalorder %s20_s26, 4  }
 0x535   :  { %19 = sbr.rel (!%p17_p5) target bundleno = 4 (0x4), region = 83 }
 0x53c   :  { %723 = vsyncpa [#allocation7], 1 }
 0x53d   :  { %725 = vsyncpa [#allocation7 + $0x1], 1 }

</bundles_post_ra>
